<compile_context>
chip_gen: v6e
topology: v6e:2x2x1
jax: 0.10.0
libtpu: 0.0.40
codegen_flags: <defaults>
</compile_context>

<pallas_src>
import functools
import math

import jax
import jax.numpy as jnp
from jax import lax
from jax.experimental import pallas as pl
from jax.experimental.pallas import tpu as pltpu

_LANES = 128
_SUBLANES = 8
_PRED_C = 3          # predict channels consumed: [amp, phi_x, phi_y]
_LAB_C = 2           # label channels consumed:   [amp, phi]
_CHUNK = 512         # rows per in-kernel sub-step (bounds live VMEM of intermediates)
_SMALL_M = 1 << 17   # below this, the fused XLA formula beats kernel fixed overheads


def _spectrum_loss_kernel(selp_ref, sell_ref, pred_ref, lab_ref, acc_ref, *, tr, chunk):
    # pred_ref: (TR, 3*128) f32  raw interleaved rows: lane k -> element k//3, channel k%3
    # lab_ref : (TR, 2*128) f32  raw interleaved rows: lane k -> element k//2, channel k%2
    # selp_ref: (384, 384) bf16  one-hot de-interleave -> [amp | phi_x | phi_y]
    # sell_ref: (256, 256) bf16  one-hot de-interleave -> [amp | phi]
    # acc_ref : (1, 3, 8, 128) f32 per-core lane-parallel SSE accumulators (kernel output)
    @pl.when(pl.program_id(1) == 0)
    def _():
        acc_ref[...] = jnp.zeros_like(acc_ref)

    sel_p = selp_ref[...]
    sel_l = sell_ref[...]
    two_pi = jnp.float32(2.0 * math.pi)
    pi = jnp.float32(math.pi)
    f32 = jnp.float32

    def deinterleave(x, sel):
        # Exact-enough channel gather on the MXU: split f32 into bf16 hi/lo parts
        # (hi + lo reproduces x to <= ~2^-17 relative); each part hits a 0/1 one-hot
        # matrix, so every output element is just hi + lo of one input element,
        # independent of any implicit f32->bf16 matmul precision policy.
        hi = x.astype(jnp.bfloat16)
        lo = (x - hi.astype(f32)).astype(jnp.bfloat16)
        return (jnp.dot(hi, sel, preferred_element_type=f32)
                + jnp.dot(lo, sel, preferred_element_type=f32))

    def body(ci, carry):
        r0 = pl.multiple_of(ci * chunk, chunk)
        p = pred_ref[pl.ds(r0, chunk), :]            # (chunk, 384)
        l = lab_ref[pl.ds(r0, chunk), :]             # (chunk, 256)

        psel = deinterleave(p, sel_p)                # (chunk, 384) = [amp | phi_x | phi_y]
        lsel = deinterleave(l, sel_l)                # (chunk, 256) = [amp | phi]

        amp_p = psel[:, 0:_LANES]
        phx_p = psel[:, _LANES:2 * _LANES]
        phy_p = psel[:, 2 * _LANES:3 * _LANES]
        amp_t = lsel[:, 0:_LANES]
        ang = two_pi * lsel[:, _LANES:2 * _LANES] - pi

        e_amp = amp_p - amp_t
        e_phx = phx_p - jnp.cos(ang)
        e_phy = phy_p - jnp.sin(ang)

        # Fold (chunk,128) squared errors into (8,128) accumulators with pure
        # cross-vreg VPU adds (no per-step XLU/SMEM round trip).
        shp = (chunk // _SUBLANES, _SUBLANES, _LANES)
        acc_ref[0, 0] += jnp.sum((e_amp * e_amp).reshape(shp), axis=0)
        acc_ref[0, 1] += jnp.sum((e_phx * e_phx).reshape(shp), axis=0)
        acc_ref[0, 2] += jnp.sum((e_phy * e_phy).reshape(shp), axis=0)
        return carry

    lax.fori_loop(0, tr // chunk, body, 0)


def _make_selection_matrix(num_channels):
    # S[k, c*128 + j] = 1  iff  k == num_channels*j + c
    n = num_channels * _LANES
    col = jnp.arange(n)
    c = col // _LANES
    j = col % _LANES
    k = jnp.arange(n)
    return (k[:, None] == (num_channels * j + c)[None, :]).astype(jnp.bfloat16)


def _device_kind():
    try:
        return jax.devices()[0].device_kind.lower()
    except Exception:
        return ""


def _core_split(kind):
    # Only add a leading core axis on parts known to expose >1 TensorCore per device.
    if "v7" in kind or "7x" in kind:
        return 2, pltpu.CORE_PARALLEL
    if "v4" in kind or "v5p" in kind:
        return 2, pltpu.PARALLEL          # classic megacore split
    return 1, pltpu.ARBITRARY             # v5e / v6e: single TensorCore


def _spectrum_loss_xla(predict, label, amp_weight, phi_weight):
    # Fused pure-XLA formula; also serves as the reference.
    amp_t = label[..., 0].astype(jnp.float32)
    amp_p = predict[..., 0].astype(jnp.float32)
    phi_t = label[..., 1].astype(jnp.float32)
    ang = 2.0 * jnp.pi * phi_t - jnp.pi
    phx_t = jnp.cos(ang)
    phy_t = jnp.sin(ang)
    phx_p = predict[..., 1].astype(jnp.float32)
    phy_p = predict[..., 2].astype(jnp.float32)
    loss_amp = amp_weight * jnp.mean((amp_p - amp_t) ** 2)
    loss_phi = phi_weight * 0.5 * (
        jnp.mean((phx_p - phx_t) ** 2) + jnp.mean((phy_p - phy_t) ** 2))
    return {"loss": loss_amp + loss_phi, "loss_amp": loss_amp, "loss_phi": loss_phi}


def spectrum_loss(predict, label, amp_weight=1.0, phi_weight=0.1, *, force_pallas=False):
    """predict: (B, N, >=3), label: (B, N, >=2). Returns dict of scalar losses."""
    B, N = predict.shape[0], predict.shape[1]
    M = B * N

    if (not force_pallas) and M < _SMALL_M:
        return _spectrum_loss_xla(predict, label, amp_weight, phi_weight)

    kind = _device_kind()
    n_cores, core_sem = _core_split(kind)
    max_tr = 4096 if ("v7" in kind or "7x" in kind) else 2048

    # Raw channel-interleaved flats (free reshapes when C matches exactly; no transpose).
    pred_flat = predict[..., :_PRED_C].astype(jnp.float32).reshape(-1)   # (3*M,)
    lab_flat = label[..., :_LAB_C].astype(jnp.float32).reshape(-1)       # (2*M,)

    rows = pl.cdiv(M, _LANES)
    if rows <= _CHUNK:
        chunk = ((rows + _SUBLANES - 1) // _SUBLANES) * _SUBLANES
        tr = chunk
    else:
        chunk = _CHUNK
        tr = min(max_tr, ((rows + chunk - 1) // chunk) * chunk)

    tiles = pl.cdiv(rows, tr)
    if n_cores > 1 and tiles >= 4:
        tiles = pl.cdiv(tiles, n_cores) * n_cores
    else:
        n_cores, core_sem = 1, pltpu.ARBITRARY
    tiles_per_core = tiles // n_cores
    rows_pad = tiles * tr
    m_pad = rows_pad * _LANES

    if m_pad != M:
        # Channel-consistent padding: amp=0/0; phi=0.5 -> angle 0 -> (cos,sin)=(1,0);
        # pred (phi_x, phi_y) = (1, 0).  Padded elements contribute exactly 0 SSE,
        # so no per-element tail mask is needed in the kernel.
        extra = m_pad - M
        pred_flat = jnp.concatenate(
            [pred_flat, jnp.tile(jnp.array([0.0, 1.0, 0.0], jnp.float32), extra)])
        lab_flat = jnp.concatenate(
            [lab_flat, jnp.tile(jnp.array([0.0, 0.5], jnp.float32), extra)])

    pred2d = pred_flat.reshape(rows_pad, _PRED_C * _LANES)
    lab2d = lab_flat.reshape(rows_pad, _LAB_C * _LANES)

    sel_p = _make_selection_matrix(_PRED_C)   # (384, 384) bf16, resident in VMEM
    sel_l = _make_selection_matrix(_LAB_C)    # (256, 256) bf16, resident in VMEM

    kernel = functools.partial(_spectrum_loss_kernel, tr=tr, chunk=chunk)

    partials = pl.pallas_call(
        kernel,
        out_shape=jax.ShapeDtypeStruct((n_cores, 3, _SUBLANES, _LANES), jnp.float32),
        grid_spec=pltpu.PrefetchScalarGridSpec(
            num_scalar_prefetch=0,
            grid=(n_cores, tiles_per_core),
            in_specs=[
                pl.BlockSpec((_PRED_C * _LANES, _PRED_C * _LANES), lambda c, i: (0, 0)),
                pl.BlockSpec((_LAB_C * _LANES, _LAB_C * _LANES), lambda c, i: (0, 0)),
                pl.BlockSpec((tr, _PRED_C * _LANES),
                             lambda c, i: (c * tiles_per_core + i, 0)),
                pl.BlockSpec((tr, _LAB_C * _LANES),
                             lambda c, i: (c * tiles_per_core + i, 0)),
            ],
            out_specs=pl.BlockSpec((1, 3, _SUBLANES, _LANES), lambda c, i: (c, 0, 0, 0)),
        ),
        compiler_params=pltpu.CompilerParams(
            dimension_semantics=(core_sem, pltpu.ARBITRARY),
            vmem_limit_bytes=40 * 1024 * 1024,
        ),
    )(sel_p, sel_l, pred2d, lab2d)

    sums = jnp.sum(partials, axis=(0, 2, 3))   # (3,) = [sse_amp, sse_phi_x, sse_phi_y]
    inv_n = jnp.float32(1.0 / M)
    loss_amp = jnp.float32(amp_weight) * (sums[0] * inv_n)
    loss_phi = jnp.float32(phi_weight) * (jnp.float32(0.5) * (sums[1] + sums[2]) * inv_n)
    return {"loss": loss_amp + loss_phi, "loss_amp": loss_amp, "loss_phi": loss_phi}


if __name__ == "__main__":
    key = jax.random.PRNGKey(0)
    k1, k2, k3, k4 = jax.random.split(key, 4)

    # Case 1: small, lane-aligned (M = 256), forced through the Pallas kernel.
    B1, N1 = 2, 128
    p1 = jax.random.normal(k1, (B1, N1, 3), dtype=jnp.float32)
    l1 = jax.random.uniform(k2, (B1, N1, 2), dtype=jnp.float32)

    # Case 2: M not a multiple of 128 -> exercises the constant-padded tail path.
    B2, N2 = 3, 1000
    p2 = jax.random.normal(k3, (B2, N2, 3), dtype=jnp.float32)
    l2 = jax.random.uniform(k4, (B2, N2, 2), dtype=jnp.float32)

    for (p, l) in ((p1, l1), (p2, l2)):
        out = spectrum_loss(p, l, amp_weight=1.0, phi_weight=0.1, force_pallas=True)
        out = jax.tree_util.tree_map(jax.block_until_ready, out)
        ref = _spectrum_loss_xla(p, l, 1.0, 0.1)
        for name in ("loss", "loss_amp", "loss_phi"):
            assert jnp.allclose(out[name], ref[name], rtol=1e-4, atol=1e-6), (
                name, out[name], ref[name])

    # Default (auto) path: small inputs route to the fused XLA formula.
    out_auto = spectrum_loss(p1, l1)
    out_auto = jax.tree_util.tree_map(jax.block_until_ready, out_auto)
    ref1 = _spectrum_loss_xla(p1, l1, 1.0, 0.1)
    assert jnp.allclose(out_auto["loss"], ref1["loss"], rtol=1e-5, atol=1e-6)

    print("KERNEL_OK")
</pallas_src>

<mosaic_0001>
module attributes {stable_mosaic.version = 11 : i64} {
  func.func @_spectrum_loss_kernel(%arg0: i32, %arg1: i32, %arg2: memref<384x384xbf16, #tpu.memory_space<vmem>>, %arg3: memref<256x256xbf16, #tpu.memory_space<vmem>>, %arg4: memref<8x384xf32, #tpu.memory_space<vmem>>, %arg5: memref<8x256xf32, #tpu.memory_space<vmem>>, %arg6: memref<1x3x8x128xf32, #tpu.memory_space<vmem>>) attributes {dimension_semantics = [#tpu.dimension_semantics<arbitrary>, #tpu.dimension_semantics<arbitrary>], iteration_bounds = array<i64: 1, 1>, scalar_prefetch = 0 : i64, scratch_operands = 0 : i64, tpu.core_type = #tpu.core_type<tc>, window_params = [{pipeline_mode = #tpu.pipeline_mode<synchronous>, transform_indices = @transform_0, window_bounds = array<i64: 384, 384>}, {pipeline_mode = #tpu.pipeline_mode<synchronous>, transform_indices = @transform_1, window_bounds = array<i64: 256, 256>}, {transform_indices = @transform_2, window_bounds = array<i64: 8, 384>}, {transform_indices = @transform_3, window_bounds = array<i64: 8, 256>}, {transform_indices = @transform_4, window_bounds = array<i64: 1, 3, 8, 128>}]} {
    %c0_i32 = arith.constant 0 : i32
    %0 = arith.cmpi eq, %arg1, %c0_i32 : i32
    %1 = arith.extui %0 : i1 to i32
    %c0_i32_0 = arith.constant 0 : i32
    %2 = arith.cmpi ne, %1, %c0_i32_0 : i32
    scf.if %2 {
      %cst_37 = arith.constant 0.000000e+00 : f32
      %66 = vector.broadcast %cst_37 : f32 to vector<1x3x8x128xf32>
      %c0_38 = arith.constant 0 : index
      %c0_39 = arith.constant 0 : index
      %c0_40 = arith.constant 0 : index
      %c0_41 = arith.constant 0 : index
      %67 = vector.load %arg6[%c0_38, %c0_39, %c0_40, %c0_41] : memref<1x3x8x128xf32, #tpu.memory_space<vmem>>, vector<1x3x8x128xf32>
      tpu.vector_store %arg6[%c0_38, %c0_39, %c0_40, %c0_41], %66 {strides = array<i32>} : memref<1x3x8x128xf32, #tpu.memory_space<vmem>>, vector<1x3x8x128xf32>,
    } else {
    }
    %c0 = arith.constant 0 : index
    %c0_1 = arith.constant 0 : index
    %3 = vector.load %arg2[%c0, %c0_1] : memref<384x384xbf16, #tpu.memory_space<vmem>>, vector<384x384xbf16>
    %c0_2 = arith.constant 0 : index
    %c0_3 = arith.constant 0 : index
    %4 = vector.load %arg3[%c0_2, %c0_3] : memref<256x256xbf16, #tpu.memory_space<vmem>>, vector<256x256xbf16>
    %cst = arith.constant 6.28318548 : f32
    %cst_4 = arith.constant 3.14159274 : f32
    %c0_i32_5 = arith.constant 0 : i32
    %c8_i32 = arith.constant 8 : i32
    %5 = arith.muli %c0_i32_5, %c8_i32 : i32
    %6 = tpu.assume_multiple %5, 8 : i32
    %7 = arith.index_cast %6 : i32 to index
    %c0_6 = arith.constant 0 : index
    %8 = vector.load %arg4[%7, %c0_6] : memref<8x384xf32, #tpu.memory_space<vmem>>, vector<8x384xf32>
    %9 = arith.index_cast %6 : i32 to index
    %c0_7 = arith.constant 0 : index
    %10 = vector.load %arg5[%9, %c0_7] : memref<8x256xf32, #tpu.memory_space<vmem>>, vector<8x256xf32>
    %11 = arith.truncf %8 : vector<8x384xf32> to vector<8x384xbf16>
    %12 = arith.extf %11 : vector<8x384xbf16> to vector<8x384xf32>
    %13 = arith.subf %8, %12 : vector<8x384xf32>
    %14 = arith.truncf %13 : vector<8x384xf32> to vector<8x384xbf16>
    %cst_8 = arith.constant dense<0.000000e+00> : vector<8x384xf32>
    %15 = tpu.matmul %11, %3, %cst_8 {dimension_numbers = #tpu.dot_dimension_numbers<[1], [0], [0], [1], [0, 0, 1, 1], [], []>} : vector<8x384xbf16>, vector<384x384xbf16>, vector<8x384xf32> -> vector<8x384xf32>
    %cst_9 = arith.constant dense<0.000000e+00> : vector<8x384xf32>
    %16 = tpu.matmul %14, %3, %cst_9 {dimension_numbers = #tpu.dot_dimension_numbers<[1], [0], [0], [1], [0, 0, 1, 1], [], []>} : vector<8x384xbf16>, vector<384x384xbf16>, vector<8x384xf32> -> vector<8x384xf32>
    %17 = arith.addf %15, %16 : vector<8x384xf32>
    %18 = arith.truncf %10 : vector<8x256xf32> to vector<8x256xbf16>
    %19 = arith.extf %18 : vector<8x256xbf16> to vector<8x256xf32>
    %20 = arith.subf %10, %19 : vector<8x256xf32>
    %21 = arith.truncf %20 : vector<8x256xf32> to vector<8x256xbf16>
    %cst_10 = arith.constant dense<0.000000e+00> : vector<8x256xf32>
    %22 = tpu.matmul %18, %4, %cst_10 {dimension_numbers = #tpu.dot_dimension_numbers<[1], [0], [0], [1], [0, 0, 1, 1], [], []>} : vector<8x256xbf16>, vector<256x256xbf16>, vector<8x256xf32> -> vector<8x256xf32>
    %cst_11 = arith.constant dense<0.000000e+00> : vector<8x256xf32>
    %23 = tpu.matmul %21, %4, %cst_11 {dimension_numbers = #tpu.dot_dimension_numbers<[1], [0], [0], [1], [0, 0, 1, 1], [], []>} : vector<8x256xbf16>, vector<256x256xbf16>, vector<8x256xf32> -> vector<8x256xf32>
    %24 = arith.addf %22, %23 : vector<8x256xf32>
    %25 = vector.extract_strided_slice %17 {offsets = [0, 0], sizes = [8, 128], strides = [1, 1]} : vector<8x384xf32> to vector<8x128xf32>
    %26 = vector.extract_strided_slice %17 {offsets = [0, 128], sizes = [8, 128], strides = [1, 1]} : vector<8x384xf32> to vector<8x128xf32>
    %27 = vector.extract_strided_slice %17 {offsets = [0, 256], sizes = [8, 128], strides = [1, 1]} : vector<8x384xf32> to vector<8x128xf32>
    %28 = vector.extract_strided_slice %24 {offsets = [0, 0], sizes = [8, 128], strides = [1, 1]} : vector<8x256xf32> to vector<8x128xf32>
    %29 = vector.extract_strided_slice %24 {offsets = [0, 128], sizes = [8, 128], strides = [1, 1]} : vector<8x256xf32> to vector<8x128xf32>
    %30 = vector.broadcast %cst : f32 to vector<8x128xf32>
    %31 = arith.mulf %30, %29 : vector<8x128xf32>
    %32 = vector.broadcast %cst_4 : f32 to vector<8x128xf32>
    %33 = arith.subf %31, %32 : vector<8x128xf32>
    %34 = arith.subf %25, %28 : vector<8x128xf32>
    %35 = math.cos %33 : vector<8x128xf32>
    %36 = arith.subf %26, %35 : vector<8x128xf32>
    %37 = math.sin %33 : vector<8x128xf32>
    %38 = arith.subf %27, %37 : vector<8x128xf32>
    %c0_12 = arith.constant 0 : index
    %c0_13 = arith.constant 0 : index
    %c0_14 = arith.constant 0 : index
    %c0_15 = arith.constant 0 : index
    %39 = vector.load %arg6[%c0_12, %c0_13, %c0_14, %c0_15] : memref<1x3x8x128xf32, #tpu.memory_space<vmem>>, vector<1x1x8x128xf32>
    %40 = vector.shape_cast %39 : vector<1x1x8x128xf32> to vector<8x128xf32>
    %41 = arith.mulf %34, %34 : vector<8x128xf32>
    %42 = vector.shape_cast %41 : vector<8x128xf32> to vector<1x8x128xf32>
    %cst_16 = arith.constant dense<0.000000e+00> : vector<8x128xf32>
    %43 = vector.multi_reduction <add>, %42, %cst_16 [0] : vector<1x8x128xf32> to vector<8x128xf32>
    %44 = arith.addf %40, %43 : vector<8x128xf32>
    %c0_17 = arith.constant 0 : index
    %c0_18 = arith.constant 0 : index
    %c0_19 = arith.constant 0 : index
    %c0_20 = arith.constant 0 : index
    %45 = vector.load %arg6[%c0_17, %c0_18, %c0_19, %c0_20] : memref<1x3x8x128xf32, #tpu.memory_space<vmem>>, vector<1x1x8x128xf32>
    %46 = vector.shape_cast %45 : vector<1x1x8x128xf32> to vector<8x128xf32>
    %47 = vector.shape_cast %44 : vector<8x128xf32> to vector<1x1x8x128xf32>
    tpu.vector_store %arg6[%c0_17, %c0_18, %c0_19, %c0_20], %47 {strides = array<i32>} : memref<1x3x8x128xf32, #tpu.memory_space<vmem>>, vector<1x1x8x128xf32>,
    %c0_21 = arith.constant 0 : index
    %c1 = arith.constant 1 : index
    %c0_22 = arith.constant 0 : index
    %c0_23 = arith.constant 0 : index
    %48 = vector.load %arg6[%c0_21, %c1, %c0_22, %c0_23] : memref<1x3x8x128xf32, #tpu.memory_space<vmem>>, vector<1x1x8x128xf32>
    %49 = vector.shape_cast %48 : vector<1x1x8x128xf32> to vector<8x128xf32>
    %50 = arith.mulf %36, %36 : vector<8x128xf32>
    %51 = vector.shape_cast %50 : vector<8x128xf32> to vector<1x8x128xf32>
    %cst_24 = arith.constant dense<0.000000e+00> : vector<8x128xf32>
    %52 = vector.multi_reduction <add>, %51, %cst_24 [0] : vector<1x8x128xf32> to vector<8x128xf32>
    %53 = arith.addf %49, %52 : vector<8x128xf32>
    %c0_25 = arith.constant 0 : index
    %c1_26 = arith.constant 1 : index
    %c0_27 = arith.constant 0 : index
    %c0_28 = arith.constant 0 : index
    %54 = vector.load %arg6[%c0_25, %c1_26, %c0_27, %c0_28] : memref<1x3x8x128xf32, #tpu.memory_space<vmem>>, vector<1x1x8x128xf32>
    %55 = vector.shape_cast %54 : vector<1x1x8x128xf32> to vector<8x128xf32>
    %56 = vector.shape_cast %53 : vector<8x128xf32> to vector<1x1x8x128xf32>
    tpu.vector_store %arg6[%c0_25, %c1_26, %c0_27, %c0_28], %56 {strides = array<i32>} : memref<1x3x8x128xf32, #tpu.memory_space<vmem>>, vector<1x1x8x128xf32>,
    %c0_29 = arith.constant 0 : index
    %c2 = arith.constant 2 : index
    %c0_30 = arith.constant 0 : index
    %c0_31 = arith.constant 0 : index
    %57 = vector.load %arg6[%c0_29, %c2, %c0_30, %c0_31] : memref<1x3x8x128xf32, #tpu.memory_space<vmem>>, vector<1x1x8x128xf32>
    %58 = vector.shape_cast %57 : vector<1x1x8x128xf32> to vector<8x128xf32>
    %59 = arith.mulf %38, %38 : vector<8x128xf32>
    %60 = vector.shape_cast %59 : vector<8x128xf32> to vector<1x8x128xf32>
    %cst_32 = arith.constant dense<0.000000e+00> : vector<8x128xf32>
    %61 = vector.multi_reduction <add>, %60, %cst_32 [0] : vector<1x8x128xf32> to vector<8x128xf32>
    %62 = arith.addf %58, %61 : vector<8x128xf32>
    %c0_33 = arith.constant 0 : index
    %c2_34 = arith.constant 2 : index
    %c0_35 = arith.constant 0 : index
    %c0_36 = arith.constant 0 : index
    %63 = vector.load %arg6[%c0_33, %c2_34, %c0_35, %c0_36] : memref<1x3x8x128xf32, #tpu.memory_space<vmem>>, vector<1x1x8x128xf32>
    %64 = vector.shape_cast %63 : vector<1x1x8x128xf32> to vector<8x128xf32>
    %65 = vector.shape_cast %62 : vector<8x128xf32> to vector<1x1x8x128xf32>
    tpu.vector_store %arg6[%c0_33, %c2_34, %c0_35, %c0_36], %65 {strides = array<i32>} : memref<1x3x8x128xf32, #tpu.memory_space<vmem>>, vector<1x1x8x128xf32>,
    %c1_i32 = arith.constant 1 : i32
    return
  }
  func.func @transform_0(%arg0: i32, %arg1: i32) -> (i32, i32) {
    %c0_i32 = arith.constant 0 : i32
    %c0_i32_0 = arith.constant 0 : i32
    %c0_i32_1 = arith.constant 0 : i32
    return %c0_i32, %c0_i32_0 : i32, i32
  }
  func.func @transform_1(%arg0: i32, %arg1: i32) -> (i32, i32) {
    %c0_i32 = arith.constant 0 : i32
    %c0_i32_0 = arith.constant 0 : i32
    %c0_i32_1 = arith.constant 0 : i32
    return %c0_i32, %c0_i32_0 : i32, i32
  }
  func.func @transform_2(%arg0: i32, %arg1: i32) -> (i32, i32) {
    %c1_i32 = arith.constant 1 : i32
    %0 = arith.muli %arg0, %c1_i32 : i32
    %1 = arith.addi %0, %arg1 : i32
    %c0_i32 = arith.constant 0 : i32
    %c0_i32_0 = arith.constant 0 : i32
    return %1, %c0_i32 : i32, i32
  }
  func.func @transform_3(%arg0: i32, %arg1: i32) -> (i32, i32) {
    %c1_i32 = arith.constant 1 : i32
    %0 = arith.muli %arg0, %c1_i32 : i32
    %1 = arith.addi %0, %arg1 : i32
    %c0_i32 = arith.constant 0 : i32
    %c0_i32_0 = arith.constant 0 : i32
    return %1, %c0_i32 : i32, i32
  }
  func.func @transform_4(%arg0: i32, %arg1: i32) -> (i32, i32, i32, i32) {
    %c0_i32 = arith.constant 0 : i32
    %c0_i32_0 = arith.constant 0 : i32
    %c0_i32_1 = arith.constant 0 : i32
    %c0_i32_2 = arith.constant 0 : i32
    return %arg0, %c0_i32, %c0_i32_0, %c0_i32_1 : i32, i32, i32, i32
  }
}

</mosaic_0001>

<bundles_post_ra>
// kernel: tpu_custom_call.1
= control target key start
LH: loop header
LB: loop body
LE: loop exit
PB: predicated region body
PF: predicated region fallthrough
CT: control target
= control target key end

     0   :  { %9 = vsyncpa [#allocation3], 0  ;;  %s2357_s0 = inlined_call_operand.hbm [shape: bf16[384,384], index: 0, kind: input, shape index: {}]   ;;  %s2358_s1 = inlined_call_operand.hbm [shape: bf16[256,256], index: 1, kind: input, shape index: {}]   ;;  %s2359_s2 = inlined_call_operand.hbm [shape: f32[8,384], index: 2, kind: input, shape index: {}]   ;;  %s2360_s3 = inlined_call_operand.hbm [shape: f32[8,256], index: 3, kind: input, shape index: {}]   ;;  %s2361_s4 = inlined_call_operand.hbm [shape: f32[1,3,8,128], index: 4, kind: output, shape index: {}]  }
   0x1   :  { %10 = vsyncpa [#allocation6], 0 }
   0x2   :  { %11 = vsyncpa [#allocation9], 0 }
   0x3   :  { %12 = vsyncpa [#allocation4], 0  ;;  %s1937_s15 = smov [#allocation5]  }
   0x4   :  { %s30_s16 = sshll.u32 %s1937_s15, 4  ;;  %s31_s16 = int_to_ptr.vmem [resolvable:$true] %s30_s16 }
   0x5   :  { %s1837_s17 = scalar_lea.vmem %s31_s16, 4096  ;;  %p1842_p1 = scmp.lt.s32.totalorder %s31_s16, %s31_s16 }
   0x6   :  { %p1838_p0 = scmp.ne.s32.totalorder %s31_s16, %s1837_s17  ;;  %p1843_p2 = scmp.lt.s32.totalorder %s1837_s17, %s1837_s17 }
   0x8   :  { %p1844_p3 = por %p1843_p2, %p1842_p1 }
   0xa   :  { %p1845_p4 = pnand %p1844_p3, %p1838_p0 }
   0xc   :  { %1848 = shalt.err (!%p1845_p4)
}
   0xd   :  { %s1938_s18 = smov 128   ;;  %s1939_s19 = smov 8  }
   0xe   :  { %36 = dma.hbm_to_vmem [thread:$0]  %s2358_s1, 4096, %s31_s16, [#allocation6], %s1938_s18, %s1938_s18, %s1939_s19  }
   0xf   :  { %s1940_s22 = smov [#allocation2]  }
  0x10   :  { %s18_s23 = sshll.u32 %s1940_s22, 4  ;;  %s19_s23 = int_to_ptr.vmem [resolvable:$true] %s18_s23 }
  0x11   :  { %s1857_s24 = scalar_lea.vmem %s19_s23, 9216  ;;  %p1862_p6 = scmp.lt.s32.totalorder %s19_s23, %s19_s23 }
  0x12   :  { %p1858_p5 = scmp.ne.s32.totalorder %s19_s23, %s1857_s24  ;;  %p1863_p7 = scmp.lt.s32.totalorder %s1857_s24, %s1857_s24 }
  0x14   :  { %p1864_p8 = por %p1863_p7, %p1862_p6 }
  0x16   :  { %p1865_p9 = pnand %p1864_p8, %p1858_p5 }
  0x18   :  { %1868 = shalt.err (!%p1865_p9)
}
  0x19   :  { %s1941_s25 = smov 192   ;;  %s1942_s26 = smov 12  }
  0x1a   :  { %24 = dma.hbm_to_vmem [thread:$0]  %s2357_s0, 9216, %s19_s23, [#allocation3], %s1941_s25, %s1941_s25, %s1942_s26  }
  0x1b   :  { %s1943_s29 = smov [#allocation7]   ;;  %s1944_s5 = smov [#allocation8]  }
  0x1c   :  { %s47_s30 = sshll.u32 %s1943_s29, 4  ;;  %s61_s1 = sshll.u32 %s1944_s5, 4  ;;  %s48_s30 = int_to_ptr.vmem [resolvable:$true] %s47_s30  ;;  %s62_s1 = int_to_ptr.vmem [resolvable:$true] %s61_s1 }
  0x1d   :  { %s1877_s6 = scalar_lea.vmem %s48_s30, 384  ;;  %p1882_p11 = scmp.lt.s32.totalorder %s48_s30, %s48_s30 }
  0x1e   :  { %p1878_p10 = scmp.ne.s32.totalorder %s48_s30, %s1877_s6  ;;  %p1883_p12 = scmp.lt.s32.totalorder %s1877_s6, %s1877_s6 }
  0x20   :  { %p1884_p13 = por %p1883_p12, %p1882_p11 }
  0x22   :  { %p1885_p0 = pnand %p1884_p13, %p1878_p10 }
  0x24   :  { %1888 = shalt.err (!%p1885_p0)
}
  0x25   :  { %50 = dma.hbm_to_vmem [thread:$0]  %s2359_s2, 384, %s48_s30, [#allocation6]  }
  0x26   :  { %s1897_s9 = scalar_lea.vmem %s62_s1, 256  ;;  %p1902_p2 = scmp.lt.s32.totalorder %s62_s1, %s62_s1 }
  0x27   :  { %p1898_p1 = scmp.ne.s32.totalorder %s62_s1, %s1897_s9  ;;  %p1903_p3 = scmp.lt.s32.totalorder %s1897_s9, %s1897_s9 }
  0x29   :  { %p1904_p4 = por %p1903_p3, %p1902_p2 }
  0x2b   :  { %p1905_p5 = pnand %p1904_p4, %p1898_p1 }
  0x2d   :  { %1908 = shalt.err (!%p1905_p5)
}
  0x2e   :  { %64 = dma.hbm_to_vmem [thread:$0]  %s2360_s3, 256, %s62_s1, [#allocation9]  }
  0x2f   :  { %1929 = dma.done.wait [#allocation3], 9216  }
  0x30   :  { %1930 = vsyncadd [#allocation3], 4294958080 }
  0x31   :  { %1931 = dma.done.wait [#allocation6], 4480  }
  0x32   :  { %1932 = vsyncadd [#allocation6], 4294962816 }
  0x33   :  { %1933 = dma.done.wait [#allocation9], 256  }
  0x34   :  { %1934 = vsyncadd [#allocation9], 4294967040  ;;  %v2362_v0 = vmov 0   ;;  %v1996_v1 = vld [vmem:[#allocation2 + $0xac] ss:$12 sps:$4 sm:$0xff]   ;;  %v220_v27 = vld [vmem:[#allocation7 + $0x10] sm:$0xff] }
  0x35   :  { %695 = vmatprep.mubr.bf16.mxu1 %v2362_v0  ;;  %v1998_v2 = vld [vmem:[#allocation2 + $0x22c] ss:$12 sps:$4 sm:$0xff]   ;;  %622 = vmatprep.subr.bf16.mxu0 %v1996_v1  ;;  %v2001_v3 = vld [vmem:[#allocation2 + $0xa8] ss:$12 sps:$4 sm:$0xff]   ;;  %v2012_v7 = vld [vmem:[#allocation2 + $0x90] ss:$12 sps:$4 sm:$0xff]   ;;  %v2074_v30 = vpack.c.bf16 %v220_v27, %v220_v27 }
  0x36   :  { %v2003_v4 = vld [vmem:[#allocation2 + $0x228] ss:$12 sps:$4 sm:$0xff]   ;;  %663 = vmatprep.subr.bf16.mxu1 %v1998_v2  ;;  %623 = vmatpush1.bf16.msra.mxu0 %v2001_v3  ;;  %v2015_v8 = vld [vmem:[#allocation2 + $0x210] ss:$12 sps:$4 sm:$0xff]   ;;  %v2022_v11 = vld [vmem:[#allocation2 + $0x78] ss:$12 sps:$4 sm:$0xff]  }
  0x37   :  { %v2006_v5 = vld [vmem:[#allocation2 + $0x94] ss:$12 sps:$4 sm:$0xff]   ;;  %664 = vmatpush1.bf16.msra.mxu1 %v2003_v4  ;;  %v2018_v9 = vld [vmem:[#allocation2 + $0x7c] ss:$12 sps:$4 sm:$0xff]   ;;  %v2024_v12 = vld [vmem:[#allocation2 + $0x1f8] ss:$12 sps:$4 sm:$0xff]   ;;  %v231_v33 = vunpack.c.l.bf16 %v2074_v30 }
  0x38   :  { %v2010_v6 = vld [vmem:[#allocation2 + $0x214] ss:$12 sps:$4 sm:$0xff]   ;;  %624 = vmatprep.subr.bf16.mxu0 %v2006_v5  ;;  %v2020_v10 = vld [vmem:[#allocation2 + $0x1fc] ss:$12 sps:$4 sm:$0xff]   ;;  %v2028_v13 = vld [vmem:[#allocation2 + $0x64] ss:$12 sps:$4 sm:$0xff]  }
  0x39   :  { %665 = vmatprep.subr.bf16.mxu1 %v2010_v6  ;;  %v2032_v14 = vld [vmem:[#allocation2 + $0x1e4] ss:$12 sps:$4 sm:$0xff]   ;;  %v2034_v15 = vld [vmem:[#allocation2 + $0x60] ss:$12 sps:$4 sm:$0xff]   ;;  %v2046_v19 = vld [vmem:[#allocation2 + $0x48] ss:$12 sps:$4 sm:$0xff]   ;;  %v234_v36 = vsub.f32 %v220_v27, %v231_v33 }
  0x3a   :  { %625 = vmatpush1.bf16.msra.mxu0 %v2012_v7  ;;  %v2038_v16 = vld [vmem:[#allocation2 + $0x1e0] ss:$12 sps:$4 sm:$0xff]   ;;  %v2048_v20 = vld [vmem:[#allocation2 + $0x1c8] ss:$12 sps:$4 sm:$0xff]   ;;  %v2058_v23 = vld [vmem:[#allocation2 + $0x30] ss:$12 sps:$4 sm:$0xff]  }
  0x3b   :  { %666 = vmatpush1.bf16.msra.mxu1 %v2015_v8  ;;  %626 = vmatprep.subr.bf16.mxu0 %v2018_v9  ;;  %v2040_v17 = vld [vmem:[#allocation2 + $0x4c] ss:$12 sps:$4 sm:$0xff]   ;;  %v2052_v21 = vld [vmem:[#allocation2 + $0x34] ss:$12 sps:$4 sm:$0xff]   ;;  %v2062_v24 = vld [vmem:[#allocation2 + $0x1b0] ss:$12 sps:$4 sm:$0xff]   ;;  %v2097_v39 = vpack.c.bf16 %v234_v36, %v234_v36 }
  0x3c   :  { %667 = vmatprep.subr.bf16.mxu1 %v2020_v10  ;;  %v2044_v18 = vld [vmem:[#allocation2 + $0x1cc] ss:$12 sps:$4 sm:$0xff]   ;;  %v2056_v22 = vld [vmem:[#allocation2 + $0x1b4] ss:$12 sps:$4 sm:$0xff]   ;;  %v2064_v25 = vld [vmem:[#allocation2 + $0x1c] ss:$12 sps:$4 sm:$0xff]  }
  0x3d   :  { %v2068_v26 = vld [vmem:[#allocation2 + $0x19c] ss:$12 sps:$4 sm:$0xff]   ;;  %v2070_v28 = vld [vmem:[#allocation2 + $0x18] ss:$12 sps:$4 sm:$0xff]   ;;  %v2085_v34 = vld [vmem:[#allocation2] ss:$12 sps:$4 sm:$0xff]  }
  0x3e   :  { %627 = vmatpush1.bf16.msra.mxu0 %v2022_v11  ;;  %v2072_v29 = vld [vmem:[#allocation2 + $0x198] ss:$12 sps:$4 sm:$0xff]   ;;  %v2087_v35 = vld [vmem:[#allocation2 + $0x180] ss:$12 sps:$4 sm:$0xff]   ;;  %v2095_v38 = vld [vmem:[#allocation2 + $0x170] ss:$12 sps:$4 sm:$0xff]  }
  0x3f   :  { %668 = vmatpush1.bf16.msra.mxu1 %v2024_v12  ;;  %628 = vmatprep.subr.bf16.mxu0 %v2028_v13  ;;  %v2078_v31 = vld [vmem:[#allocation2 + $0x4] ss:$12 sps:$4 sm:$0xff]   ;;  %v2091_v37 = vld [vmem:[#allocation2 + $0x16c] ss:$12 sps:$4 sm:$0xff]   ;;  %v2099_v40 = vld [vmem:[#allocation2 + $0x168] ss:$12 sps:$4 sm:$0xff]  }
  0x40   :  { %669 = vmatprep.subr.bf16.mxu1 %v2032_v14  ;;  %v2082_v32 = vld [vmem:[#allocation2 + $0x184] ss:$12 sps:$4 sm:$0xff]   ;;  %v2107_v42 = vld [vmem:[#allocation2 + $0x154] ss:$12 sps:$4 sm:$0xff]   ;;  %v2118_v46 = vld [vmem:[#allocation2 + $0x13c] ss:$12 sps:$4 sm:$0xff]  }
  0x41   :  { %v2103_v41 = vld [vmem:[#allocation2 + $0xb0] ss:$12 sps:$4 sm:$0xff]   ;;  %v2109_v43 = vld [vmem:[#allocation2 + $0x158] ss:$12 sps:$4 sm:$0xff]   ;;  %v2122_v47 = vld [vmem:[#allocation2 + $0x140] ss:$12 sps:$4 sm:$0xff]  }
  0x42   :  { %629 = vmatpush1.bf16.msra.mxu0 %v2034_v15  ;;  %v2111_v44 = vld [vmem:[#allocation2 + $0x150] ss:$12 sps:$4 sm:$0xff]   ;;  %v2114_v45 = vld [vmem:[#allocation2 + $0x98] ss:$12 sps:$4 sm:$0xff]   ;;  %2374 = vst [vmem:[#allocation16_spill] sm:$0xff] %v2122_v47  ;;  %v219_v59 = vld [vmem:[#allocation7 + $0x8] sm:$0xff] }
  0x43   :  { %670 = vmatpush1.bf16.msra.mxu1 %v2038_v16  ;;  %630 = vmatprep.subr.bf16.mxu0 %v2040_v17  ;;  %2373 = vst [vmem:[#allocation15_spill] sm:$0xff] %v2114_v45  ;;  %v2124_v48 = vld [vmem:[#allocation2 + $0x138] ss:$12 sps:$4 sm:$0xff]   ;;  %v2128_v49 = vld [vmem:[#allocation2 + $0x80] ss:$12 sps:$4 sm:$0xff]   ;;  %v2160_v62 = vpack.c.bf16 %v219_v59, %v219_v59  ;;  %vm1947_vm0 = vmmov 0  }
  0x44   :  { %671 = vmatprep.subr.bf16.mxu1 %v2044_v18  ;;  %2375 = vst [vmem:[#allocation17_spill] sm:$0xff] %v2128_v49  ;;  %v2130_v50 = vld [vmem:[#allocation2 + $0x124] ss:$12 sps:$4 sm:$0xff]   ;;  %v2134_v51 = vld [vmem:[#allocation2 + $0x128] ss:$12 sps:$4 sm:$0xff]   ;;  %s1954_s2 = smov [#allocation10]  }
  0x45   :  { %2376 = vst [vmem:[#allocation18_spill] sm:$0xff] %v2134_v51  ;;  %v2136_v52 = vld [vmem:[#allocation2 + $0x120] ss:$12 sps:$4 sm:$0xff]   ;;  %v2138_v53 = vld [vmem:[#allocation2 + $0x68] ss:$12 sps:$4 sm:$0xff]   ;;  %v230_v33 = vunpack.c.l.bf16 %v2160_v62  ;;  %s1430_s3 = sshll.u32 %s1954_s2, 4  ;;  %s1431_s3 = int_to_ptr.vmem [resolvable:$true] %s1430_s3 }
  0x46   :  { %631 = vmatpush1.bf16.msra.mxu0 %v2046_v19  ;;  %2377 = vst [vmem:[#allocation19_spill] sm:$0xff] %v2138_v53  ;;  %v2142_v54 = vld [vmem:[#allocation2 + $0x10c] ss:$12 sps:$4 sm:$0xff]   ;;  %v2146_v55 = vld [vmem:[#allocation2 + $0x110] ss:$12 sps:$4 sm:$0xff]   ;;  %v218_v60 = vld [vmem:[#allocation7] sm:$0xff]  ;;  %p1914_p7 = scmp.lt.s32.totalorder %s1431_s3, %s1431_s3 }
  0x47   :  { %672 = vmatpush1.bf16.msra.mxu1 %v2048_v20  ;;  %632 = vmatprep.subr.bf16.mxu0 %v2052_v21  ;;  %2378 = vst [vmem:[#allocation20_spill] sm:$0xff] %v2146_v55  ;;  %v2148_v56 = vld [vmem:[#allocation2 + $0x108] ss:$12 sps:$4 sm:$0xff]   ;;  %v2150_v57 = vld [vmem:[#allocation2 + $0x50] ss:$12 sps:$4 sm:$0xff]   ;;  %v2167_v36 = vpack.c.bf16 %v218_v60, %v218_v60  ;;  %s1909_s11 = scalar_lea.vmem %s1431_s3, 384 }
  0x48   :  { %673 = vmatprep.subr.bf16.mxu1 %v2056_v22  ;;  %2379 = vst [vmem:[#allocation21_spill] sm:$0xff] %v2150_v57  ;;  %v2154_v58 = vld [vmem:[#allocation2 + $0xf4] ss:$12 sps:$4 sm:$0xff]   ;;  %v2158_v61 = vld [vmem:[#allocation2 + $0xf8] ss:$12 sps:$4 sm:$0xff]   ;;  %p1910_p6 = scmp.ne.s32.totalorder %s1431_s3, %s1909_s11  ;;  %p1915_p8 = scmp.lt.s32.totalorder %s1909_s11, %s1909_s11 }
  0x49   :  { %2380 = vst [vmem:[#allocation22_spill] sm:$0xff] %v2158_v61  ;;  %v2162_v63 = vld [vmem:[#allocation2 + $0xf0] ss:$12 sps:$4 sm:$0xff]   ;;  %v2164_v27 = vld [vmem:[#allocation2 + $0x38] ss:$12 sps:$4 sm:$0xff]  }
  0x4a   :  { %633 = vmatpush1.bf16.msra.mxu0 %v2058_v23  ;;  %2381 = vst [vmem:[#allocation23_spill] sm:$0xff] %v2164_v27  ;;  %v2171_v0 = vld [vmem:[#allocation2 + $0xdc] ss:$12 sps:$4 sm:$0xff]   ;;  %p1916_p9 = por %p1915_p8, %p1914_p7 }
  0x4b   :  { %674 = vmatpush1.bf16.msra.mxu1 %v2062_v24  ;;  %634 = vmatprep.subr.bf16.mxu0 %v2064_v25 }
  0x4c   :  { %675 = vmatprep.subr.bf16.mxu1 %v2068_v26  ;;  %p1917_p10 = pnand %p1916_p9, %p1910_p6 }
  0x4e   :  { %635 = vmatpush1.bf16.msra.mxu0 %v2070_v28 }
  0x4f   :  { %676 = vmatpush1.bf16.msra.mxu1 %v2072_v29  ;;  %636 = vmatprep.subr.bf16.mxu0 %v2078_v31 }
  0x50   :  { %677 = vmatprep.subr.bf16.mxu1 %v2082_v32 }
  0x52   :  { %637 = vmatpush1.bf16.msra.mxu0 %v2085_v34 }
  0x53   :  { %678 = vmatpush1.bf16.msra.mxu1 %v2087_v35  ;;  %638 = vmatprep.subr.bf16.mxu0 %v2091_v37 }
  0x54   :  { %1557 = vmatprep.subr.bf16.mxu1 %v2095_v38 }
  0x56   :  { %696 = vmatmul.mubr.bf16.vlgmr.msra.gmra.mxu1 %v2097_v39  ;;  %639 = vmatpush2.bf16.msra.mxu0 %v2099_v40 }
  0x57   :  { %1558 = vmatpush3.bf16.msra.mxu1 %v2103_v41  ;;  %640 = vmatprep.subr.bf16.mxu0 %v2107_v42 }
  0x58   :  { %1559 = vmatprep.subr.bf16.mxu1 %v2109_v43 }
  0x5a   :  { %641 = vmatpush2.bf16.msra.mxu0 %v2111_v44 }
  0x5b   :  { %1560 = vmatpush3.bf16.msra.mxu1 %v2114_v45  ;;  %642 = vmatprep.subr.bf16.mxu0 %v2118_v46  ;;  %v229_v45 = vunpack.c.l.bf16 %v2167_v36 }
  0x5c   :  { %1561 = vmatprep.subr.bf16.mxu1 %v2122_v47 }
  0x5e   :  { %643 = vmatpush2.bf16.msra.mxu0 %v2124_v48 }
  0x5f   :  { %1562 = vmatpush3.bf16.msra.mxu1 %v2128_v49  ;;  %644 = vmatprep.subr.bf16.mxu0 %v2130_v50  ;;  %v2179_v49 = vld [vmem:[#allocation2 + $0x20] ss:$12 sps:$4 sm:$0xff]  }
  0x60   :  { %1563 = vmatprep.subr.bf16.mxu1 %v2134_v51  ;;  %v2177_v51 = vld [vmem:[#allocation2 + $0xd8] ss:$12 sps:$4 sm:$0xff]  }
  0x62   :  { %645 = vmatpush2.bf16.msra.mxu0 %v2136_v52 }
  0x63   :  { %1564 = vmatpush3.bf16.msra.mxu1 %v2138_v53  ;;  %646 = vmatprep.subr.bf16.mxu0 %v2142_v54  ;;  %v233_v53 = vsub.f32 %v219_v59, %v230_v33  ;;  %v232_v59 = vsub.f32 %v218_v60, %v229_v45  ;;  %v2194_v33 = vld [vmem:[#allocation2 + $0x8] ss:$12 sps:$4 sm:$0xff]   ;;  %v1946_v45 = vmov 0.0  }
  0x64   :  { %1565 = vmatprep.subr.bf16.mxu1 %v2146_v55  ;;  %v2175_v55 = vld [vmem:[#allocation2 + $0xe0] ss:$12 sps:$4 sm:$0xff]  }
  0x65   :  { %2382 = vst [vmem:[#allocation24_spill] sm:$0xff] %v2175_v55  ;;  %v236_v47 = vpack.c.bf16 %v233_v53, %v233_v53  ;;  %v2192_v53 = vld [vmem:[#allocation2 + $0xc0] ss:$12 sps:$4 sm:$0xff]  }
  0x66   :  { %647 = vmatpush2.bf16.msra.mxu0 %v2148_v56 }
  0x67   :  { %1566 = vmatpush3.bf16.msra.mxu1 %v2150_v57  ;;  %648 = vmatprep.subr.bf16.mxu0 %v2154_v58  ;;  %v2184_v57 = vld [vmem:[#allocation2 + $0xc4] ss:$12 sps:$4 sm:$0xff]  }
  0x68   :  { %1567 = vmatprep.subr.bf16.mxu1 %v2158_v61  ;;  %v2188_v61 = vld [vmem:[#allocation2 + $0xc8] ss:$12 sps:$4 sm:$0xff]   ;;  %654 = vmatprep.mubr.bf16.mxu0 %v236_v47 }
  0x69   :  { %736 = vmatprep.mubr.bf16.mxu1 %v236_v47  ;;  %v2206_v47 = vld [vmem:[#allocation2 + $0x218] ss:$12 sps:$4 sm:$0xff]  }
  0x6a   :  { %649 = vmatpush2.bf16.msra.mxu0 %v2162_v63 }
  0x6b   :  { %1568 = vmatpush3.bf16.msra.mxu1 %v2164_v27  ;;  %650 = vmatprep.subr.bf16.mxu0 %v2171_v0  ;;  %v235_v27 = vpack.c.bf16 %v232_v59, %v232_v59 }
  0x6c   :  { %1569 = vmatprep.subr.bf16.mxu1 %v2175_v55  ;;  %v2200_v55 = vld [vmem:[#allocation2 + $0x230] ss:$12 sps:$4 sm:$0xff]  }
  0x6e   :  { %651 = vmatpush2.bf16.msra.mxu0 %v2177_v51 }
  0x6f   :  { %1570 = vmatpush3.bf16.msra.mxu1 %v2179_v49  ;;  %652 = vmatprep.subr.bf16.mxu0 %v2184_v57 }
  0x70   :  { %1571 = vmatprep.subr.bf16.mxu1 %v2188_v61 }
  0x72   :  { %653 = vmatpush2.bf16.msra.mxu0 %v2192_v53 }
  0x73   :  { %1572 = vmatpush3.bf16.msra.mxu1 %v2194_v33  ;;  %1619 = vmatprep.subr.bf16.mxu0 %v1946_v45 }
  0x74   :  { %784 = vmatprep.subr.bf16.mxu1 %v1996_v1  ;;  %v2215_v1 = vld [vmem:[#allocation2 + $0x200] ss:$12 sps:$4 sm:$0xff]  }
  0x75   :  { %655 = vmatmul.mubr.bf16.vlgmr.msra.gmra.mxu0 %v235_v27 }
  0x76   :  { %737 = vmatmul.mubr.bf16.vlgmr.msra.gmra.mxu1 %v235_v27  ;;  %1620 = vmatpush3.bf16.msra.mxu0 %v2200_v55  ;;  %v1822_v27 = vld [vmem:[#allocation5 + $0x80] ss:$8 sps:$4 sm:$0xff]  }
  0x77   :  { %785 = vmatpush1.bf16.msra.mxu1 %v2001_v3  ;;  %1621 = vmatprep.subr.bf16.mxu0 %v1946_v45  ;;  %v2221_v3 = vld [vmem:[#allocation2 + $0x1e8] ss:$12 sps:$4 sm:$0xff]  }
  0x78   :  { %786 = vmatprep.subr.bf16.mxu1 %v2006_v5  ;;  %1635 = vmatprep.mubr.msk.bf16.mxu0 %vm1947_vm0, %v1946_v45  ;;  %v2227_v5 = vld [vmem:[#allocation2 + $0x1d0] ss:$12 sps:$4 sm:$0xff]  }
  0x79   :  { %816 = vmatprep.mubr.bf16.mxu1 %v2160_v62 }
  0x7a   :  { %1622 = vmatpush3.bf16.msra.mxu0 %v2206_v47 }
  0x7b   :  { %787 = vmatpush1.bf16.msra.mxu1 %v2012_v7  ;;  %1623 = vmatprep.subr.bf16.mxu0 %v1946_v45  ;;  %v2233_v7 = vld [vmem:[#allocation2 + $0x1b8] ss:$12 sps:$4 sm:$0xff]  }
  0x7c   :  { %788 = vmatprep.subr.bf16.mxu1 %v2018_v9  ;;  %v2239_v9 = vld [vmem:[#allocation2 + $0x1a0] ss:$12 sps:$4 sm:$0xff]  }
  0x7e   :  { %1624 = vmatpush3.bf16.msra.mxu0 %v2215_v1 }
  0x7f   :  { %789 = vmatpush1.bf16.msra.mxu1 %v2022_v11  ;;  %1625 = vmatprep.subr.bf16.mxu0 %v1946_v45  ;;  %v2245_v11 = vld [vmem:[#allocation2 + $0x188] ss:$12 sps:$4 sm:$0xff]  }
  0x80   :  { %790 = vmatprep.subr.bf16.mxu1 %v2028_v13  ;;  %v2383_v13 = vmov 0  }
  0x82   :  { %1626 = vmatpush3.bf16.msra.mxu0 %v2221_v3 }
  0x83   :  { %791 = vmatpush1.bf16.msra.mxu1 %v2034_v15  ;;  %1627 = vmatprep.subr.bf16.mxu0 %v1946_v45  ;;  %v2391_v15 = vld [vmem:[#allocation22_spill] sm:$0xff] }
  0x84   :  { %792 = vmatprep.subr.bf16.mxu1 %v2040_v17  ;;  %v2392_v17 = vld [vmem:[#allocation23_spill] sm:$0xff] }
  0x86   :  { %1628 = vmatpush3.bf16.msra.mxu0 %v2227_v5 }
  0x87   :  { %793 = vmatpush1.bf16.msra.mxu1 %v2046_v19  ;;  %1629 = vmatprep.subr.bf16.mxu0 %v1946_v45 }
  0x88   :  { %794 = vmatprep.subr.bf16.mxu1 %v2052_v21 }
  0x8a   :  { %1630 = vmatpush3.bf16.msra.mxu0 %v2233_v7 }
  0x8b   :  { %795 = vmatpush1.bf16.msra.mxu1 %v2058_v23  ;;  %1631 = vmatprep.subr.bf16.mxu0 %v1946_v45  ;;  %v1782_v23 = vld [vmem:[#allocation5 + $0x64] ss:$8 sps:$4 sm:$0xff]  }
  0x8c   :  { %796 = vmatprep.subr.bf16.mxu1 %v2064_v25  ;;  %v1780_v25 = vld [vmem:[#allocation5 + $0x60] ss:$8 sps:$4 sm:$0xff]  }
  0x8e   :  { %1632 = vmatpush3.bf16.msra.mxu0 %v2239_v9 }
  0x8f   :  { %797 = vmatpush1.bf16.msra.mxu1 %v2070_v28  ;;  %1633 = vmatprep.subr.bf16.mxu0 %v1946_v45  ;;  %v1783_v28 = vld [vmem:[#allocation5 + $0x50] ss:$8 sps:$4 sm:$0xff]  }
  0x90   :  { %798 = vmatprep.subr.bf16.mxu1 %v2078_v31  ;;  %v1786_v31 = vld [vmem:[#allocation5 + $0x40] ss:$8 sps:$4 sm:$0xff]  }
  0x92   :  { %1634 = vmatpush3.bf16.msra.mxu0 %v2245_v11 }
  0x93   :  { %799 = vmatpush1.bf16.msra.mxu1 %v2085_v34  ;;  %825 = vmatprep.subr.bf16.mxu0 %v1998_v2  ;;  %v2385_v2 = vld [vmem:[#allocation16_spill] sm:$0xff] }
  0x94   :  { %800 = vmatprep.subr.bf16.mxu1 %v2091_v37  ;;  %v1794_v34 = vld [vmem:[#allocation5 + $0x24] ss:$8 sps:$4 sm:$0xff]   ;;  %v1797_v37 = vld [vmem:[#allocation5 + $0x14] ss:$8 sps:$4 sm:$0xff]  }
  0x95   :  { %1636 = vmatmul.mubr.bf16.vlgmr.msra.gmra.mxu0 %v2097_v39  ;;  %v1800_v39 = vld [vmem:[#allocation5 + $0x4] ss:$8 sps:$4 sm:$0xff]  }
  0x96   :  { %826 = vmatpush1.bf16.msra.mxu0 %v2003_v4  ;;  %857 = vmatprep.mubr.bf16.mxu0 %v2383_v13  ;;  %v2386_v4 = vld [vmem:[#allocation17_spill] sm:$0xff] }
  0x97   :  { %801 = vmatpush2.bf16.msra.mxu1 %v2099_v40  ;;  %827 = vmatprep.subr.bf16.mxu0 %v2010_v6  ;;  %v2387_v6 = vld [vmem:[#allocation18_spill] sm:$0xff]  ;;  %v1798_v40 = vld [vmem:[#allocation5] ss:$8 sps:$4 sm:$0xff]  }
  0x98   :  { %802 = vmatprep.subr.bf16.mxu1 %v2107_v42  ;;  %v1801_v42 = vld [vmem:[#allocation5 + $0xf0] ss:$8 sps:$4 sm:$0xff]  }
  0x9a   :  { %828 = vmatpush1.bf16.msra.mxu0 %v2015_v8  ;;  %v2388_v8 = vld [vmem:[#allocation19_spill] sm:$0xff] }
  0x9b   :  { %803 = vmatpush2.bf16.msra.mxu1 %v2111_v44  ;;  %829 = vmatprep.subr.bf16.mxu0 %v2020_v10  ;;  %v2389_v10 = vld [vmem:[#allocation20_spill] sm:$0xff] }
  0x9c   :  { %804 = vmatprep.subr.bf16.mxu1 %v2118_v46  ;;  %v1804_v44 = vld [vmem:[#allocation5 + $0xe0] ss:$8 sps:$4 sm:$0xff]   ;;  %v1809_v46 = vld [vmem:[#allocation5 + $0xd4] ss:$8 sps:$4 sm:$0xff]  }
  0x9e   :  { %830 = vmatpush1.bf16.msra.mxu0 %v2024_v12  ;;  %v225_v12 = vld [vmem:[#allocation8 + $0x8] sm:$0xff] }
  0x9f   :  { %805 = vmatpush2.bf16.msra.mxu1 %v2124_v48  ;;  %831 = vmatprep.subr.bf16.mxu0 %v2032_v14  ;;  %v2390_v14 = vld [vmem:[#allocation21_spill] sm:$0xff] }
  0xa0   :  { %806 = vmatprep.subr.bf16.mxu1 %v2130_v50  ;;  %v1807_v48 = vld [vmem:[#allocation5 + $0xd0] ss:$8 sps:$4 sm:$0xff]   ;;  %v1810_v50 = vld [vmem:[#allocation5 + $0xc0] ss:$8 sps:$4 sm:$0xff]  }
  0xa2   :  { %832 = vmatpush1.bf16.msra.mxu0 %v2038_v16  ;;  %v947_v16 = vpack.c.bf16 %v225_v12, %v225_v12 }
  0xa3   :  { %807 = vmatpush2.bf16.msra.mxu1 %v2136_v52  ;;  %833 = vmatprep.subr.bf16.mxu0 %v2044_v18  ;;  %v2393_v18 = vld [vmem:[#allocation24_spill] sm:$0xff]  ;;  %v1813_v52 = vld [vmem:[#allocation5 + $0xb0] ss:$8 sps:$4 sm:$0xff]  }
  0xa4   :  { %808 = vmatprep.subr.bf16.mxu1 %v2142_v54  ;;  %v949_v19 = vunpack.c.l.bf16 %v947_v16  ;;  %v224_v54 = vld [vmem:[#allocation8] sm:$0xff] }
  0xa6   :  { %834 = vmatpush1.bf16.msra.mxu0 %v2048_v20  ;;  %v1779_v20 = vld [vmem:[#allocation5 + $0x74] ss:$8 sps:$4 sm:$0xff]   ;;  %v951_v21 = vsub.f32 %v225_v12, %v949_v19 }
  0xa7   :  { %809 = vmatpush2.bf16.msra.mxu1 %v2148_v56  ;;  %835 = vmatprep.subr.bf16.mxu0 %v2056_v22  ;;  %v1777_v22 = vld [vmem:[#allocation5 + $0x70] ss:$8 sps:$4 sm:$0xff]   ;;  %v946_v56 = vpack.c.bf16 %v224_v54, %v224_v54 }
  0xa8   :  { %810 = vmatprep.subr.bf16.mxu1 %v2154_v58  ;;  %v1821_v58 = vld [vmem:[#allocation5 + $0x94] ss:$8 sps:$4 sm:$0xff]  }
  0xa9   :  { %v948_v60 = vunpack.c.l.bf16 %v946_v56 }
  0xaa   :  { %836 = vmatpush1.bf16.msra.mxu0 %v2062_v24  ;;  %v953_v24 = vpack.c.bf16 %v951_v21, %v951_v21 }
  0xab   :  { %811 = vmatpush2.bf16.msra.mxu1 %v2162_v63  ;;  %837 = vmatprep.subr.bf16.mxu0 %v2068_v26  ;;  %v1785_v26 = vld [vmem:[#allocation5 + $0x54] ss:$8 sps:$4 sm:$0xff]   ;;  %v950_v63 = vsub.f32 %v224_v54, %v948_v60 }
  0xac   :  { %812 = vmatprep.subr.bf16.mxu1 %v2171_v0  ;;  %v2384_v0 = vld [vmem:[#allocation15_spill] sm:$0xff] }
  0xae   :  { %838 = vmatpush1.bf16.msra.mxu0 %v2072_v29  ;;  %v1788_v29 = vld [vmem:[#allocation5 + $0x44] ss:$8 sps:$4 sm:$0xff]  }
  0xaf   :  { %813 = vmatpush2.bf16.msra.mxu1 %v2177_v51  ;;  %839 = vmatprep.subr.bf16.mxu0 %v2082_v32  ;;  %v1789_v32 = vld [vmem:[#allocation5 + $0x30] ss:$8 sps:$4 sm:$0xff]   ;;  %v1815_v51 = vld [vmem:[#allocation5 + $0xb4] ss:$8 sps:$4 sm:$0xff]  }
  0xb0   :  { %814 = vmatprep.subr.bf16.mxu1 %v2184_v57  ;;  %v1816_v57 = vld [vmem:[#allocation5 + $0xa0] ss:$8 sps:$4 sm:$0xff]  }
  0xb2   :  { %840 = vmatpush1.bf16.msra.mxu0 %v2087_v35  ;;  %v1792_v35 = vld [vmem:[#allocation5 + $0x20] ss:$8 sps:$4 sm:$0xff]  }
  0xb3   :  { %815 = vmatpush2.bf16.msra.mxu1 %v2192_v53  ;;  %1588 = vmatprep.subr.bf16.mxu0 %v2095_v38  ;;  %v1795_v38 = vld [vmem:[#allocation5 + $0x10] ss:$8 sps:$4 sm:$0xff]  }
  0xb4   :  { %1639 = vmatprep.subr.bf16.mxu1 %v1946_v45 }
  0xb5   :  { %858 = vmatmul.mubr.bf16.vlgmr.msra.gmra.mxu0 %v2074_v30 }
  0xb6   :  { %817 = vmatmul.mubr.bf16.vlgmr.msra.gmra.mxu1 %v2167_v36  ;;  %1589 = vmatpush3.bf16.msra.mxu0 %v2103_v41  ;;  %v1803_v41 = vld [vmem:[#allocation5 + $0xf4] ss:$8 sps:$4 sm:$0xff]  }
  0xb7   :  { %1640 = vmatpush3.bf16.msra.mxu1 %v2200_v55  ;;  %1590 = vmatprep.subr.bf16.mxu0 %v2109_v43  ;;  %v1806_v43 = vld [vmem:[#allocation5 + $0xe4] ss:$8 sps:$4 sm:$0xff]  }
  0xb8   :  { %1641 = vmatprep.subr.bf16.mxu1 %v1946_v45  ;;  %898 = vmatprep.mubr.bf16.mxu0 %v2160_v62  ;;  %v1818_v55 = vld [vmem:[#allocation5 + $0xa4] ss:$8 sps:$4 sm:$0xff]  }
  0xb9   :  { %1655 = vmatprep.mubr.msk.bf16.mxu1 %vm1947_vm0, %v1946_v45  ;;  %v1824_v62 = vld [vmem:[#allocation5 + $0x84] ss:$8 sps:$4 sm:$0xff]  }
  0xba   :  { %1591 = vmatpush3.bf16.msra.mxu0 %v2384_v0 }
  0xbb   :  { %1642 = vmatpush3.bf16.msra.mxu1 %v2206_v47  ;;  %1592 = vmatprep.subr.bf16.mxu0 %v2385_v2 }
  0xbc   :  { %1643 = vmatprep.subr.bf16.mxu1 %v1946_v45 }
  0xbe   :  { %1593 = vmatpush3.bf16.msra.mxu0 %v2386_v4 }
  0xbf   :  { %1644 = vmatpush3.bf16.msra.mxu1 %v2215_v1  ;;  %1594 = vmatprep.subr.bf16.mxu0 %v2387_v6 }
  0xc0   :  { %1645 = vmatprep.subr.bf16.mxu1 %v1946_v45 }
  0xc2   :  { %1595 = vmatpush3.bf16.msra.mxu0 %v2388_v8 }
  0xc3   :  { %1646 = vmatpush3.bf16.msra.mxu1 %v2221_v3  ;;  %1596 = vmatprep.subr.bf16.mxu0 %v2389_v10 }
  0xc4   :  { %1647 = vmatprep.subr.bf16.mxu1 %v1946_v45 }
  0xc6   :  { %1597 = vmatpush3.bf16.msra.mxu0 %v2390_v14 }
  0xc7   :  { %1648 = vmatpush3.bf16.msra.mxu1 %v2227_v5  ;;  %1598 = vmatprep.subr.bf16.mxu0 %v2391_v15 }
  0xc8   :  { %1649 = vmatprep.subr.bf16.mxu1 %v1946_v45 }
  0xca   :  { %1599 = vmatpush3.bf16.msra.mxu0 %v2392_v17 }
  0xcb   :  { %1650 = vmatpush3.bf16.msra.mxu1 %v2233_v7  ;;  %1600 = vmatprep.subr.bf16.mxu0 %v2393_v18 }
  0xcc   :  { %1651 = vmatprep.subr.bf16.mxu1 %v1946_v45 }
  0xce   :  { %1601 = vmatpush3.bf16.msra.mxu0 %v2179_v49  ;;  %v1812_v49 = vld [vmem:[#allocation5 + $0xc4] ss:$8 sps:$4 sm:$0xff]  }
  0xcf   :  { %1652 = vmatpush3.bf16.msra.mxu1 %v2239_v9  ;;  %1602 = vmatprep.subr.bf16.mxu0 %v2188_v61  ;;  %v1819_v61 = vld [vmem:[#allocation5 + $0x90] ss:$8 sps:$4 sm:$0xff]  }
  0xd0   :  { %1653 = vmatprep.subr.bf16.mxu1 %v1946_v45 }
  0xd2   :  { %1603 = vmatpush3.bf16.msra.mxu0 %v2194_v33 }
  0xd3   :  { %1654 = vmatpush3.bf16.msra.mxu1 %v2245_v11  ;;  %1114 = vmatprep.subr.bf16.mxu0 %v1779_v20 }
  0xd4   :  { %1155 = vmatprep.subr.bf16.mxu1 %v1779_v20 }
  0xd5   :  { %899 = vmatmul.mubr.bf16.vlgmr.msra.gmra.mxu0 %v2167_v36  ;;  %v952_v36 = vpack.c.bf16 %v950_v63, %v950_v63 }
  0xd6   :  { %1656 = vmatmul.mubr.bf16.vlgmr.msra.gmra.mxu1 %v2074_v30  ;;  %1115 = vmatpush1.bf16.msra.mxu0 %v1777_v22  ;;  %v1791_v30 = vld [vmem:[#allocation5 + $0x34] ss:$8 sps:$4 sm:$0xff]  }
  0xd7   :  { %1156 = vmatpush1.bf16.msra.mxu1 %v1777_v22  ;;  %1116 = vmatprep.subr.bf16.mxu0 %v1782_v23 }
  0xd8   :  { %1157 = vmatprep.subr.bf16.mxu1 %v1782_v23  ;;  %1146 = vmatprep.mubr.bf16.mxu0 %v953_v24 }
  0xd9   :  { %1187 = vmatprep.mubr.bf16.mxu1 %v947_v16 }
  0xda   :  { %1117 = vmatpush1.bf16.msra.mxu0 %v1780_v25 }
  0xdb   :  { %1158 = vmatpush1.bf16.msra.mxu1 %v1780_v25  ;;  %1118 = vmatprep.subr.bf16.mxu0 %v1785_v26 }
  0xdc   :  { %1159 = vmatprep.subr.bf16.mxu1 %v1785_v26 }
  0xde   :  { %1119 = vmatpush1.bf16.msra.mxu0 %v1783_v28 }
  0xdf   :  { %1160 = vmatpush1.bf16.msra.mxu1 %v1783_v28  ;;  %1120 = vmatprep.subr.bf16.mxu0 %v1788_v29 }
  0xe0   :  { %1161 = vmatprep.subr.bf16.mxu1 %v1788_v29 }
  0xe2   :  { %1121 = vmatpush1.bf16.msra.mxu0 %v1786_v31 }
  0xe3   :  { %1162 = vmatpush1.bf16.msra.mxu1 %v1786_v31  ;;  %1122 = vmatprep.subr.bf16.mxu0 %v1791_v30 }
  0xe4   :  { %1163 = vmatprep.subr.bf16.mxu1 %v1791_v30 }
  0xe6   :  { %1123 = vmatpush1.bf16.msra.mxu0 %v1789_v32 }
  0xe7   :  { %1164 = vmatpush1.bf16.msra.mxu1 %v1789_v32  ;;  %1124 = vmatprep.subr.bf16.mxu0 %v1794_v34 }
  0xe8   :  { %1165 = vmatprep.subr.bf16.mxu1 %v1794_v34 }
  0xea   :  { %1125 = vmatpush1.bf16.msra.mxu0 %v1792_v35 }
  0xeb   :  { %1166 = vmatpush1.bf16.msra.mxu1 %v1792_v35  ;;  %1126 = vmatprep.subr.bf16.mxu0 %v1797_v37 }
  0xec   :  { %1167 = vmatprep.subr.bf16.mxu1 %v1797_v37 }
  0xee   :  { %1127 = vmatpush1.bf16.msra.mxu0 %v1795_v38 }
  0xef   :  { %1168 = vmatpush1.bf16.msra.mxu1 %v1795_v38  ;;  %1128 = vmatprep.subr.bf16.mxu0 %v1800_v39 }
  0xf0   :  { %1169 = vmatprep.subr.bf16.mxu1 %v1800_v39 }
  0xf2   :  { %1129 = vmatpush1.bf16.msra.mxu0 %v1798_v40 }
  0xf3   :  { %1170 = vmatpush1.bf16.msra.mxu1 %v1798_v40  ;;  %1130 = vmatprep.subr.bf16.mxu0 %v1803_v41 }
  0xf4   :  { %1171 = vmatprep.subr.bf16.mxu1 %v1803_v41 }
  0xf6   :  { %1131 = vmatpush2.bf16.msra.mxu0 %v1801_v42 }
  0xf7   :  { %1172 = vmatpush2.bf16.msra.mxu1 %v1801_v42  ;;  %1132 = vmatprep.subr.bf16.mxu0 %v1806_v43 }
  0xf8   :  { %1173 = vmatprep.subr.bf16.mxu1 %v1806_v43 }
  0xfa   :  { %1133 = vmatpush2.bf16.msra.mxu0 %v1804_v44 }
  0xfb   :  { %1174 = vmatpush2.bf16.msra.mxu1 %v1804_v44  ;;  %1134 = vmatprep.subr.bf16.mxu0 %v1809_v46 }
  0xfc   :  { %1175 = vmatprep.subr.bf16.mxu1 %v1809_v46 }
  0xfe   :  { %1135 = vmatpush2.bf16.msra.mxu0 %v1807_v48 }
  0xff   :  { %1176 = vmatpush2.bf16.msra.mxu1 %v1807_v48  ;;  %1136 = vmatprep.subr.bf16.mxu0 %v1812_v49 }
 0x100   :  { %1177 = vmatprep.subr.bf16.mxu1 %v1812_v49 }
 0x102   :  { %1137 = vmatpush2.bf16.msra.mxu0 %v1810_v50 }
 0x103   :  { %1178 = vmatpush2.bf16.msra.mxu1 %v1810_v50  ;;  %1138 = vmatprep.subr.bf16.mxu0 %v1815_v51 }
 0x104   :  { %1179 = vmatprep.subr.bf16.mxu1 %v1815_v51 }
 0x106   :  { %1139 = vmatpush2.bf16.msra.mxu0 %v1813_v52 }
 0x107   :  { %1180 = vmatpush2.bf16.msra.mxu1 %v1813_v52  ;;  %1140 = vmatprep.subr.bf16.mxu0 %v1818_v55 }
 0x108   :  { %1181 = vmatprep.subr.bf16.mxu1 %v1818_v55 }
 0x10a   :  { %1141 = vmatpush2.bf16.msra.mxu0 %v1816_v57 }
 0x10b   :  { %1182 = vmatpush2.bf16.msra.mxu1 %v1816_v57  ;;  %1142 = vmatprep.subr.bf16.mxu0 %v1821_v58 }
 0x10c   :  { %1183 = vmatprep.subr.bf16.mxu1 %v1821_v58 }
 0x10e   :  { %1143 = vmatpush2.bf16.msra.mxu0 %v1819_v61 }
 0x10f   :  { %1184 = vmatpush2.bf16.msra.mxu1 %v1819_v61  ;;  %1144 = vmatprep.subr.bf16.mxu0 %v1824_v62 }
 0x110   :  { %1185 = vmatprep.subr.bf16.mxu1 %v1824_v62 }
 0x112   :  { %1145 = vmatpush2.bf16.msra.mxu0 %v1822_v27 }
 0x113   :  { %1186 = vmatpush2.bf16.msra.mxu1 %v1822_v27 }
 0x115   :  { %1147 = vmatmul.mubr.bf16.vlgmr.msra.gmra.mxu0 %v952_v36 }
 0x116   :  { %v697_v59 = vpop.f32.mrf.mxu1  ;;  %1188 = vmatmul.mubr.bf16.vlgmr.msra.gmra.mxu1 %v946_v56 }
 0x118   :  { %v699_v53 = vpop.f32.mrf.mxu1 }
 0x11a   :  { %v701_v33 = vpop.f32.mrf.mxu1 }
 0x11c   :  { %v702_v45 = vpop.f32.mrf.mxu1 }
 0x11d   :  { %v1948_v45 = vmov 683565275  }
 0x135   :  { %v656_v47 = vpop.f32.mrf.mxu0 }
 0x136   :  { %v1573_v1 = vpop.f32.mrf.mxu1  ;;  %v698_v3 = vadd.f32 %v697_v59, %v656_v47 }
 0x137   :  { %v658_v5 = vpop.f32.mrf.mxu0 }
 0x138   :  { %v1574_v7 = vpop.f32.mrf.mxu1  ;;  %v700_v9 = vadd.f32 %v699_v53, %v658_v5 }
 0x139   :  { %v1575_v11 = vadd.f32 %v1574_v7, %v1573_v1  ;;  %v660_v13 = vpop.f32.mrf.mxu0  ;;  %v1949_v1 = vmov 2475754826   ;;  %v1950_v7 = vmov 2131351028  }
 0x13a   :  { %v1576_v0 = vpop.f32.mrf.mxu1  ;;  %v1951_v13 = vmov 2102212464  }
 0x13b   :  { %v661_v2 = vpop.f32.mrf.mxu0 }
 0x13c   :  { %v1577_v4 = vpop.f32.mrf.mxu1 }
 0x13d   :  { %v1952_v4 = vmov 920167782  }
 0x155   :  { %v778_v6 = vpop.f32.mrf.mxu0 }
 0x156   :  { %v779_v8 = vadd.f32 %v1575_v11, %v778_v6 }
 0x157   :  { %v1637_v10 = vpop.f32.mrf.mxu0 }
 0x158   :  { %v1953_v10 = vmov 1326507024  }
 0x159   :  { %v781_v12 = vpop.f32.mrf.mxu0 }
 0x15b   :  { %v1638_v14 = vpop.f32.mrf.mxu0 }
 0x175   :  { %v859_v16 = vpop.f32.mrf.mxu0 }
 0x176   :  { %v818_v15 = vpop.f32.mrf.mxu1 }
 0x177   :  { %v819_v17 = vadd.f32 %v818_v15, %v698_v3  ;;  %v861_v19 = vpop.f32.mrf.mxu0 }
 0x178   :  { %v820_v18 = vpop.f32.mrf.mxu1 }
 0x179   :  { %v860_v20 = vadd.f32 %v859_v16, %v819_v17  ;;  %v821_v21 = vadd.f32 %v820_v18, %v700_v9  ;;  %v863_v23 = vpop.f32.mrf.mxu0 }
 0x17a   :  { %v822_v22 = vpop.f32.mrf.mxu1 }
 0x17b   :  { %v2324_v24 = vadd.f32 %v861_v19, %v821_v21  ;;  %v864_v26 = vpop.f32.mrf.mxu0 }
 0x17c   :  { %v823_v25 = vpop.f32.mrf.mxu1 }
 0x195   :  { %v1604_v28 = vpop.f32.mrf.mxu0 }
 0x196   :  { %v940_v29 = vpop.f32.mrf.mxu1 }
 0x197   :  { %v1605_v31 = vpop.f32.mrf.mxu0 }
 0x198   :  { %v1657_v30 = vpop.f32.mrf.mxu1  ;;  %v1606_v32 = vadd.f32 %v1605_v31, %v1604_v28 }
 0x199   :  { %v1607_v34 = vpop.f32.mrf.mxu0 }
 0x19a   :  { %v943_v35 = vpop.f32.mrf.mxu1  ;;  %v901_v37 = vadd.f32 %v1606_v32, %v779_v8 }
 0x19b   :  { %v1608_v38 = vpop.f32.mrf.mxu0 }
 0x19c   :  { %v1658_v39 = vpop.f32.mrf.mxu1  ;;  %v2326_v40 = vadd.f32 %v940_v29, %v901_v37 }
 0x1d5   :  { %v1148_v41 = vpop.f32.mrf.mxu0 }
 0x1d6   :  { %v1189_v42 = vpop.f32.mrf.mxu1 }
 0x1d7   :  { %v1190_v43 = vadd.f32 %v1189_v42, %v1148_v41  ;;  %v1150_v44 = vpop.f32.mrf.mxu0 }
 0x1d8   :  { %v1191_v46 = vpop.f32.mrf.mxu1 }
 0x1d9   :  { %v1198_v48 = vsub.f32 %v860_v20, %v1190_v43  ;;  %v1192_v49 = vadd.f32 %v1191_v46, %v1150_v44  ;;  %v1152_v50 = vpop.f32.mrf.mxu0 }
 0x1da   :  { %v1193_v51 = vpop.f32.mrf.mxu1 }
 0x1db   :  { %v1409_v52 = vmul.f32 %v1198_v48, %v1198_v48  ;;  %v1196_v54 = vmul.f32 6.2831855, %v1192_v49  ;;  %v1153_v55 = vpop.f32.mrf.mxu0 }
 0x1dc   :  { %v1194_v56 = vpop.f32.mrf.mxu1 }
 0x1dd   :  { %v2328_v57 = vadd.f32 -3.1415927, %v1196_v54  ;;  %1412 = vst [vmem:[#allocation10] sm:$0xff] %v1409_v52 }
 0x1df   :  { %v1202_v58 = vand.u32 2139095040, %v2328_v57  ;;  %v1199_v63 = vand.u32 2147483647, %v2328_v57  ;;  %vm1201_vm8 = vcmp.lt.s32.totalorder %v2328_v57, 0  ;;  %vm1291_vm0 = vweird.f32 %v2328_v57 }
 0x1e1   :  { %v1203_v60 = vshrl.u32 %v1202_v58, 23  ;;  %v1206_v59 = vand.u32 8388607, %v1199_v63  ;;  %vm1200_vm9 = vcmp.le.f32.partialorder %v1199_v63, 0.7853982 }
 0x1e3   :  { %v1549_v61 = vadd.s32 4294967169, %v1203_v60  ;;  %v1207_v14 = vor.u32 8388608, %v1206_v59 }
 0x1e5   :  { %v1209_v62 = vadd.s32 1, %v1549_v61  ;;  %v1247_v31 = vshll.u32 %v1207_v14, 8 }
 0x1e7   :  { %vm1210_vm1 = vcmp.gt.s32.totalorder %v1209_v62, 0 }
 0x1e8   :  { %v1211_v27 = vsel %vm1210_vm1, %v1209_v62, 0 }
 0x1e9   :  { %v1213_v36 = vand.u32 31, %v1211_v27  ;;  %v1212_v33 = vshrl.u32 %v1211_v27, 5 }
 0x1eb   :  { %v1214_v53 = vsub.s32 32, %v1213_v36  ;;  %v1216_v47 = vshll.u32 %v1948_v45, %v1213_v36  ;;  %v1219_v3 = vshll.u32 %v1949_v1, %v1213_v36  ;;  %v1222_v11 = vshll.u32 %v1950_v7, %v1213_v36 }
 0x1ec   :  { %v1225_v2 = vshll.u32 %v1951_v13, %v1213_v36  ;;  %v1228_v8 = vshll.u32 %v1952_v4, %v1213_v36  ;;  %vm1231_vm2 = vcmp.lt.s32.totalorder %v1212_v33, 1  ;;  %vm1234_vm3 = vcmp.lt.s32.totalorder %v1212_v33, 4 }
 0x1ed   :  { %v1217_v5 = vshrl.u32 %v1949_v1, %v1214_v53  ;;  %v1220_v9 = vshrl.u32 %v1950_v7, %v1214_v53  ;;  %v1223_v0 = vshrl.u32 %v1951_v13, %v1214_v53  ;;  %v1226_v6 = vshrl.u32 %v1952_v4, %v1214_v53 }
 0x1ee   :  { %v1229_v12 = vshrl.u32 %v1953_v10, %v1214_v53  ;;  %v1215_v23 = vshrl.u32 %v1948_v45, %v1214_v53  ;;  %vm1233_vm4 = vcmp.lt.s32.totalorder %v1212_v33, 3  ;;  %vm1232_vm5 = vcmp.lt.s32.totalorder %v1212_v33, 2 }
 0x1ef   :  { %v1218_v15 = vor.u32 %v1217_v5, %v1216_v47  ;;  %v1221_v16 = vor.u32 %v1220_v9, %v1219_v3  ;;  %v1224_v17 = vor.u32 %v1223_v0, %v1222_v11  ;;  %v1227_v18 = vor.u32 %v1226_v6, %v1225_v2 }
 0x1f0   :  { %v1230_v19 = vor.u32 %v1229_v12, %v1228_v8 }
 0x1f1   :  { %v1236_v20 = vsel %vm1234_vm3, %v1224_v17, 2102212464  ;;  %v1239_v21 = vsel %vm1231_vm2, %v1218_v15, %v1221_v16  ;;  %v1243_v22 = vsel %vm1231_vm2, %v1221_v16, %v1224_v17  ;;  %v1240_v25 = vsel %vm1234_vm3, %v1227_v18, 920167782 }
 0x1f2   :  { %v1244_v26 = vsel %vm1234_vm3, %v1230_v19, 1326507024  ;;  %v1241_v28 = vsel %vm1233_vm4, %v1224_v17, %v1240_v25  ;;  %v1235_v30 = vsel %vm1231_vm2, %v1215_v23, %v1218_v15  ;;  %v1237_v32 = vsel %vm1233_vm4, %v1221_v16, %v1236_v20 }
 0x1f3   :  { %v1245_v29 = vsel %vm1233_vm4, %v1227_v18, %v1244_v26  ;;  %v1242_v34 = vsel %vm1232_vm5, %v1239_v21, %v1241_v28  ;;  %v1238_v42 = vsel %vm1232_vm5, %v1235_v30, %v1237_v32 }
 0x1f4   :  { %v1246_v35 = vsel %vm1232_vm5, %v1243_v22, %v1245_v29  ;;  %v2337_v39 = vmul.u32.u64.low %v1247_v31, %v1242_v34  ;;  %v2338_v41 = vmul.u32.u64.high %v1247_v31, %v1242_v34, %v2337_v39  ;;  %v1254_v44 = vmul.u32 %v1247_v31, %v1238_v42 }
 0x1f5   :  { %v2334_v37 = vmul.u32.u64.low %v1247_v31, %v1246_v35  ;;  %v2335_v38 = vmul.u32.u64.high %v1247_v31, %v1246_v35, %v2334_v37 }
 0x1f6   :  { %v1257_v43 = vadd.s32 1, %v2338_v41 }
 0x1f7   :  { %vm1256_vm6 = vc.u32 %v2335_v38, %v2337_v39  ;;  %v1255_v61 = vadd.s32 %v2337_v39, %v2335_v38 }
 0x1f8   :  { %v1258_v46 = vsel %vm1256_vm6, %v1257_v43, %v2338_v41 }
 0x1f9   :  { %v1259_v48 = vadd.s32 %v1258_v46, %v1254_v44 }
 0x1fb   :  { %v1260_v49 = vadd.s32 536870912, %v1259_v48 }
 0x1fd   :  { %v1261_v50 = vshrl.u32 %v1260_v49, 30 }
 0x1ff   :  { %v1262_v51 = vshll.u32 %v1261_v50, 30  ;;  %v1285_v9 = vsub.s32 4, %v1261_v50 }
 0x201   :  { %v1263_v52 = vsub.s32 %v1259_v48, %v1262_v51  ;;  %v1286_v0 = vsel %vm1201_vm8, %v1285_v9, %v1261_v50 }
 0x202   :  { %v1288_v2 = vsel %vm1200_vm9, 0, %v1286_v0 }
 0x203   :  { %v1265_v54 = vsub.s32 0, %v1263_v52  ;;  %v1396_v4 = vadd.s32 3, %v1288_v2  ;;  %v1292_v6 = vand.u32 3, %v1288_v2 }
 0x205   :  { %v1550_v55 = vmin.u32 %v1265_v54, %v1263_v52  ;;  %v1397_v8 = vand.u32 3, %v1396_v4  ;;  %vm1297_vm10 = vcmp.eq.s32.totalorder %v1292_v6, 2  ;;  %vm1294_vm12 = vcmp.eq.s32.totalorder %v1292_v6, 0 }
 0x206   :  { %vm1293_vm14 = vcmp.lt.s32.totalorder %v1292_v6, 2 }
 0x207   :  { %v1267_v56 = vclz %v1550_v55  ;;  %vm1402_vm11 = vcmp.eq.s32.totalorder %v1397_v8, 2  ;;  %vm1399_vm13 = vcmp.eq.s32.totalorder %v1397_v8, 0  ;;  %vm1398_vm15 = vcmp.lt.s32.totalorder %v1397_v8, 2 }
 0x209   :  { %v1551_v58 = vadd.s32 4294967294, %v1267_v56 }
 0x20b   :  { %vm1552_vm7 = vcmp.lt.s32.totalorder %v1551_v58, 0 }
 0x20c   :  { %v1270_v60 = vsel %vm1552_vm7, 0, %v1551_v58 }
 0x20d   :  { %v1271_v62 = vsub.s32 32, %v1270_v60  ;;  %v1275_v27 = vsub.s32 4294967266, %v1270_v60  ;;  %v1272_v36 = vshll.u32 %v1263_v52, %v1270_v60 }
 0x20f   :  { %v1273_v59 = vshrl.u32 %v1255_v61, %v1271_v62  ;;  %v1276_v53 = vadd.s32 127, %v1275_v27 }
 0x211   :  { %v1274_v33 = vor.u32 %v1273_v59, %v1272_v36  ;;  %v1277_v45 = vshll.u32 %v1276_v53, 23 }
 0x213   :  { %v1278_v47 = vor.u32 4788187, %v1277_v45  ;;  %v1281_v3 = vcvt.s32.f32 %v1274_v33 }
 0x215   :  { %v1279_v1 = vand.u32 2147483647, %v1278_v47 }
 0x217   :  { %v1282_v5 = vmul.f32 %v1281_v3, %v1279_v1 }
 0x219   :  { %v1283_v7 = vxor.u32 2147483648, %v1282_v5 }
 0x21b   :  { %v1284_v11 = vsel %vm1201_vm8, %v1283_v7, %v1282_v5 }
 0x21c   :  { %v1287_v13 = vsel %vm1200_vm9, %v2328_v57, %v1284_v11 }
 0x21d   :  { %1825 = vcosq.f32 %v1287_v13 }
 0x21e   :  { %1827 = vsinq.f32 %v1287_v13 }
 0x22a   :  { %v1826_v10 = vpop.eup %1825 }
 0x22b   :  { %v1828_v12 = vpop.eup %1827  ;;  %v1298_v14 = vxor.u32 2147483648, %v1826_v10 }
 0x22c   :  { %v1295_v15 = vxor.u32 2147483648, %v1828_v12 }
 0x22d   :  { %v1299_v16 = vsel %vm1297_vm10, %v1298_v14, %v1828_v12  ;;  %v1404_v63 = vsel %vm1402_vm11, %v1298_v14, %v1828_v12 }
 0x22e   :  { %v1296_v17 = vsel %vm1294_vm12, %v1826_v10, %v1295_v15  ;;  %v1401_v18 = vsel %vm1399_vm13, %v1826_v10, %v1295_v15 }
 0x22f   :  { %v1300_v19 = vsel %vm1293_vm14, %v1296_v17, %v1299_v16  ;;  %v1405_v20 = vsel %vm1398_vm15, %v1401_v18, %v1404_v63 }
 0x230   :  { %v1301_v21 = vsel %vm1291_vm0, nan, %v1300_v19  ;;  %v1406_v22 = vsel %vm1291_vm0, nan, %v1405_v20 }
 0x231   :  { %v1302_v23 = vsub.f32 %v2324_v24, %v1301_v21  ;;  %v1407_v25 = vsub.f32 %v2326_v40, %v1406_v22 }
 0x233   :  { %v1415_v26 = vmul.f32 %v1302_v23, %v1302_v23  ;;  %v1421_v28 = vmul.f32 %v1407_v25, %v1407_v25 }
 0x235   :  { %1418 = vst [vmem:[#allocation10 + $0x8] sm:$0xff] %v1415_v26  ;;  %1424 = vst [vmem:[#allocation10 + $0x10] sm:$0xff] %v1421_v28 }
 0x236   :  { %1920 = shalt.err (!%p1917_p10)
}
 0x237   :  { %1436 = dma.vmem_to_hbm [thread:$0]  %s1431_s3, 384, %s2361_s4, [#allocation4], %s1938_s18, %s1938_s18, %s1939_s19  }
 0x238   :  { %1935 = dma.done.wait [#allocation4], 384  }
 0x239   :  { %1936 = vsyncadd [#allocation4], 4294966912 }
 0x23a   :  { %1440 = vsyncpa [#allocation3], 1 }
 0x23b   :  { %1441 = vsyncpa [#allocation6], 1 }
 0x23c   :  { %1442 = vsyncpa [#allocation9], 1 }
 0x23d   :  { %1443 = vsyncpa [#allocation4], 1 }

</bundles_post_ra>
